<compile_context>
chip_gen: v7x
topology: tpu7x:2x2x1
jax: 0.10.0
libtpu: 0.0.40
codegen_flags: <defaults>
</compile_context>

<pallas_src>
import functools
import math

import jax
import jax.numpy as jnp
from jax.experimental import pallas as pl
from jax.experimental.pallas import tpu as pltpu


def _round_up(x, m):
    return ((x + m - 1) // m) * m


def _cdiv(a, b):
    return -(-a // b)


def _sublane_multiple(dtype):
    # Rows per native sublane tile: f32 -> 8, bf16 -> 16, int8/fp8 -> 32.
    return 8 * (4 // max(1, jnp.dtype(dtype).itemsize))


def _rope_two_out_kernel(inv_full_ref, cos_ref, sin_ref, *, tile, scaling):
    """dim >= 128 path: full-width cos/sin for one row tile, two lane-dense
    outputs.  inv_full = cat(inv_half, inv_half) of shape (1, dim)."""
    i = pl.program_id(0)
    # f32 positions (matches the PyTorch reference; exact only up to 2^24 rows).
    pos = (i * tile + jax.lax.broadcasted_iota(jnp.int32, (tile, 1), 0)).astype(
        jnp.float32
    )
    freqs = pos * inv_full_ref[...]            # (tile, dim); aligned VPU
    c = jnp.cos(freqs)                         # EUP; write-bound kernel so the
    s = jnp.sin(freqs)                         # full-width trig is not binding
    if scaling != 1.0:                         # static; f32 before any downcast
        c = c * scaling
        s = s * scaling
    cos_ref[...] = c.astype(cos_ref.dtype)
    sin_ref[...] = s.astype(sin_ref.dtype)


def _rope_slab_kernel(table_ref, out_ref, *, tile, scaling):
    """dim < 128 path: one lane-dense [tile, 2*dim] slab  [cos | sin], computed
    as a single full-width cos(pos*inv + phase)  (sin(x) = cos(x - pi/2)) so
    there is no cross-lane concat.  table row 0 = inv4 = [ih|ih|ih|ih],
    table row 1 = phase = [0..0, -pi/2..-pi/2]; both length 2*dim."""
    i = pl.program_id(0)
    pos = (i * tile + jax.lax.broadcasted_iota(jnp.int32, (tile, 1), 0)).astype(
        jnp.float32
    )
    vals = jnp.cos(pos * table_ref[0:1, :] + table_ref[1:2, :])   # (tile, 2*dim)
    if scaling != 1.0:
        vals = vals * scaling
    out_ref[...] = vals.astype(out_ref.dtype)


def _build_rope_cache(inv_freq_half, seq_cache, scaling, cache_dtype=jnp.float32,
                      tile=4096):
    """inv_freq_half: (dim//2,) unique inverse frequencies.

    Returns (cos, sin), each [seq_pad, dim] (seq_pad >= seq_cache, padded rows
    unused) in `cache_dtype`, already scaled by `scaling`.
    """
    half = int(inv_freq_half.shape[0])
    dim = 2 * half
    inv_half = inv_freq_half.astype(jnp.float32)

    two_outputs = dim >= 128            # keep output lane width >= 128
    item = jnp.dtype(cache_dtype).itemsize
    sub = _sublane_multiple(cache_dtype)

    # VMEM gate: the double-buffered outputs are 2 * tile * (2*dim) * itemsize
    # bytes in total (whether split into two refs or one slab).  An 8 MiB
    # budget leaves ample headroom under the smallest scoped-VMEM default
    # (v5e: 16 MiB; v6e/v7x: 32 MiB) for the tiny input + temporaries.
    vmem_budget = 8 * 1024 * 1024
    max_tile_vmem = max(sub, vmem_budget // (2 * 2 * dim * item))

    # Keep >= 2 grid steps when the cache is big enough: v7x shards the
    # 'parallel' axis across its 2 TensorCores (a single step idles one core);
    # on single-TC v5e/v6e the extra ~0.35us step is negligible.
    half_rows = _round_up(max(_cdiv(seq_cache, 2), 1), sub)

    tile = min(tile, max_tile_vmem, half_rows)
    tile = _round_up(max(tile, sub), sub)
    seq_pad = _round_up(seq_cache, tile)
    grid = (seq_pad // tile,)

    if two_outputs:
        inv_full = jnp.concatenate([inv_half, inv_half]).reshape(1, dim)
        kernel = functools.partial(_rope_two_out_kernel, tile=tile,
                                   scaling=float(scaling))
        cos, sin = pl.pallas_call(
            kernel,
            out_shape=(jax.ShapeDtypeStruct((seq_pad, dim), cache_dtype),
                       jax.ShapeDtypeStruct((seq_pad, dim), cache_dtype)),
            grid_spec=pltpu.PrefetchScalarGridSpec(
                num_scalar_prefetch=0,
                grid=grid,
                # (1, dim) == full array dims -> (8,128) rule satisfied;
                # constant index_map -> no re-DMA across steps.
                in_specs=[pl.BlockSpec((1, dim), lambda i: (0, 0))],
                out_specs=(pl.BlockSpec((tile, dim), lambda i: (i, 0)),
                           pl.BlockSpec((tile, dim), lambda i: (i, 0))),
            ),
            compiler_params=pltpu.CompilerParams(
                dimension_semantics=("parallel",)),
        )(inv_full)
        return cos, sin

    # dim < 128: lane-dense [cos | sin] slab, split once at build time.
    inv4 = jnp.concatenate([inv_half] * 4).reshape(1, 2 * dim)
    phase = jnp.concatenate(
        [jnp.zeros((dim,), jnp.float32),
         jnp.full((dim,), -0.5 * math.pi, jnp.float32)]).reshape(1, 2 * dim)
    table = jnp.concatenate([inv4, phase], axis=0)            # (2, 2*dim)
    kernel = functools.partial(_rope_slab_kernel, tile=tile,
                               scaling=float(scaling))
    slab = pl.pallas_call(
        kernel,
        out_shape=jax.ShapeDtypeStruct((seq_pad, 2 * dim), cache_dtype),
        grid_spec=pltpu.PrefetchScalarGridSpec(
            num_scalar_prefetch=0,
            grid=grid,
            in_specs=[pl.BlockSpec((2, 2 * dim), lambda i: (0, 0))],
            out_specs=pl.BlockSpec((tile, 2 * dim), lambda i: (i, 0)),
        ),
        compiler_params=pltpu.CompilerParams(
            dimension_semantics=("parallel",)),
    )(table)
    cos = slab[:, :dim]            # one-time split (cache build only)
    sin = slab[:, dim:]
    return cos, sin


class GaudiRotaryEmbeddingPallas:
    """JAX/Pallas port of GaudiRotaryEmbedding (default rope_type)."""

    def __init__(self, dim, max_position_embeddings=2048, base=10000.0,
                 scaling_factor=1.0, cache_dtype=jnp.float32, tile=4096):
        self.dim = dim
        self.base = base
        self.original_max_seq_len = max_position_embeddings
        self.tile = tile
        # 'default' rope init: attention_scaling = 1.0
        # TODO(synk): only the 'default' rope_type init is implemented; dynamic
        # NTK / llama3 rope_init_fns are config-driven and not ported here.
        self.attention_scaling = 1.0
        exponent = jnp.arange(0, dim, 2, dtype=jnp.float32) / dim
        self.inv_freq = 1.0 / (base ** exponent)                  # [dim//2]
        self._cache_dtype = jnp.dtype(cache_dtype)
        self._set_cos_sin_cache(max_position_embeddings, self._cache_dtype)

    def _set_cos_sin_cache(self, seq_len, dtype):
        self.max_seq_len_cached = seq_len
        self._cache_dtype = jnp.dtype(dtype)
        # attention_scaling is folded into the build (f32 math before downcast)
        # and the cache is stored in the compute dtype, so __call__ only slices.
        self._cos_cached, self._sin_cached = _build_rope_cache(
            self.inv_freq, seq_len, scaling=self.attention_scaling,
            cache_dtype=self._cache_dtype, tile=self.tile)

    def __call__(self, x, seq_len):
        # NOTE: cache growth / dtype switch is host-side Python; seq_len must be
        # a concrete int (not a traced value) for the growth path to trigger.
        if jnp.dtype(x.dtype) != self._cache_dtype:
            # Rebuild once in the compute dtype -> forward never casts again.
            self._set_cos_sin_cache(self.max_seq_len_cached, x.dtype)
        if seq_len > self.max_seq_len_cached:
            # Grow to a power-of-two bucket to avoid a rebuild/recompile for
            # every new longer seq_len.
            new_len = max(self.original_max_seq_len,
                          1 << (int(seq_len) - 1).bit_length())
            self._set_cos_sin_cache(new_len, x.dtype)
        return self._cos_cached[:seq_len], self._sin_cached[:seq_len]


if __name__ == "__main__":
    key = jax.random.PRNGKey(0)

    def reference(dim_, seq_cache_, base=10000.0):
        inv = 1.0 / (base ** (jnp.arange(0, dim_, 2, dtype=jnp.float32) / dim_))
        t = jnp.arange(seq_cache_, dtype=jnp.float32)
        emb = jnp.concatenate([jnp.outer(t, inv)] * 2, axis=-1)
        return jnp.cos(emb), jnp.sin(emb)

    # ---- Path 1: dim < 128 (slab kernel), small module-consistent shapes ----
    dim, max_pos, batch, heads, seq_len = 64, 128, 2, 4, 8
    x = jax.random.normal(key, (batch, heads, seq_len, dim), dtype=jnp.float32)

    rope = GaudiRotaryEmbeddingPallas(dim=dim, max_position_embeddings=max_pos)
    cos, sin = rope(x, seq_len=seq_len)
    cos = jax.block_until_ready(cos)
    sin = jax.block_until_ready(sin)

    cos_ref, sin_ref = reference(dim, max_pos)
    assert cos.shape == (seq_len, dim) and sin.shape == (seq_len, dim)
    assert cos.dtype == x.dtype and sin.dtype == x.dtype
    assert jnp.allclose(cos, cos_ref[:seq_len], atol=1e-4)
    assert jnp.allclose(sin, sin_ref[:seq_len], atol=1e-4)

    # Full-cache path (seq_len == cached length).
    cos_full, sin_full = rope(x, seq_len=max_pos)
    jax.block_until_ready(cos_full)
    assert cos_full.shape == (max_pos, dim)
    assert jnp.allclose(cos_full, cos_ref, atol=1e-4)
    assert jnp.allclose(sin_full, sin_ref, atol=1e-4)

    # bf16 compute dtype: cache rebuilds once in bf16; __call__ only slices.
    x_bf16 = x.astype(jnp.bfloat16)
    cos_b, sin_b = rope(x_bf16, seq_len=seq_len)
    jax.block_until_ready(cos_b)
    assert cos_b.dtype == jnp.bfloat16 and sin_b.dtype == jnp.bfloat16
    assert jnp.allclose(cos_b.astype(jnp.float32), cos_ref[:seq_len], atol=2e-2)
    assert jnp.allclose(sin_b.astype(jnp.float32), sin_ref[:seq_len], atol=2e-2)

    # ---- Path 2: dim >= 128 (two lane-dense outputs, no slab split) ----
    dim2, max_pos2, seq_len2 = 128, 256, 16
    x2 = jax.random.normal(key, (batch, heads, seq_len2, dim2), dtype=jnp.float32)
    rope2 = GaudiRotaryEmbeddingPallas(dim=dim2, max_position_embeddings=max_pos2)
    cos2, sin2 = rope2(x2, seq_len=seq_len2)
    jax.block_until_ready(cos2)
    cos2_ref, sin2_ref = reference(dim2, max_pos2)
    assert cos2.shape == (seq_len2, dim2) and sin2.shape == (seq_len2, dim2)
    assert jnp.allclose(cos2, cos2_ref[:seq_len2], atol=1e-4)
    assert jnp.allclose(sin2, sin2_ref[:seq_len2], atol=1e-4)

    print("KERNEL_OK")
</pallas_src>

<mosaic_0001>
module attributes {stable_mosaic.version = 11 : i64} {
  func.func @_rope_slab_kernel(%arg0: i32, %arg1: memref<2x128xf32, #tpu.memory_space<vmem>>, %arg2: memref<64x128xf32, #tpu.memory_space<vmem>>) attributes {dimension_semantics = [#tpu.dimension_semantics<parallel>], iteration_bounds = array<i64: 2>, scalar_prefetch = 0 : i64, scratch_operands = 0 : i64, tpu.core_type = #tpu.core_type<tc>, window_params = [{pipeline_mode = #tpu.pipeline_mode<synchronous>, transform_indices = @transform_0, window_bounds = array<i64: 2, 128>}, {transform_indices = @transform_1, window_bounds = array<i64: 64, 128>}]} {
    %c64_i32 = arith.constant 64 : i32
    %0 = arith.muli %arg0, %c64_i32 : i32
    %1 = tpu.iota {dimensions = array<i32: 0>} : vector<64x1xi32>
    %2 = vector.broadcast %0 : i32 to vector<64x1xi32>
    %3 = arith.addi %2, %1 : vector<64x1xi32>
    %4 = arith.sitofp %3 : vector<64x1xi32> to vector<64x1xf32>
    %c0 = arith.constant 0 : index
    %c0_0 = arith.constant 0 : index
    %5 = vector.load %arg1[%c0, %c0_0] : memref<2x128xf32, #tpu.memory_space<vmem>>, vector<1x128xf32>
    %6 = vector.broadcast %4 : vector<64x1xf32> to vector<64x128xf32>
    %7 = vector.broadcast %5 : vector<1x128xf32> to vector<64x128xf32>
    %8 = arith.mulf %6, %7 : vector<64x128xf32>
    %c1 = arith.constant 1 : index
    %c0_1 = arith.constant 0 : index
    %9 = vector.load %arg1[%c1, %c0_1] : memref<2x128xf32, #tpu.memory_space<vmem>>, vector<1x128xf32>
    %10 = vector.broadcast %9 : vector<1x128xf32> to vector<64x128xf32>
    %11 = arith.addf %8, %10 : vector<64x128xf32>
    %12 = math.cos %11 : vector<64x128xf32>
    %c0_2 = arith.constant 0 : index
    %c0_3 = arith.constant 0 : index
    %13 = vector.load %arg2[%c0_2, %c0_3] : memref<64x128xf32, #tpu.memory_space<vmem>>, vector<64x128xf32>
    tpu.vector_store %arg2[%c0_2, %c0_3], %12 {strides = array<i32>} : memref<64x128xf32, #tpu.memory_space<vmem>>, vector<64x128xf32>,
    return
  }
  func.func @transform_0(%arg0: i32) -> (i32, i32) {
    %c0_i32 = arith.constant 0 : i32
    %c0_i32_0 = arith.constant 0 : i32
    %c0_i32_1 = arith.constant 0 : i32
    return %c0_i32, %c0_i32_0 : i32, i32
  }
  func.func @transform_1(%arg0: i32) -> (i32, i32) {
    %c0_i32 = arith.constant 0 : i32
    %c0_i32_0 = arith.constant 0 : i32
    return %arg0, %c0_i32 : i32, i32
  }
}

</mosaic_0001>

<bundles_post_ra>
// kernel: tpu_custom_call.1
= control target key start
LH: loop header
LB: loop body
LE: loop exit
PB: predicated region body
PF: predicated region fallthrough
CT: control target
= control target key end

     0   :  { %6 = vsyncpa [#allocation3], 0  ;;  %s2068_s0 = inlined_call_operand.hbm [shape: f32[2,128], index: 0, kind: input, shape index: {}]   ;;  %s2069_s1 = inlined_call_operand.hbm [shape: f32[128,128], index: 1, kind: output, shape index: {}]  }
   0x1   :  { %7 = vsyncpa [#allocation4], 0 }
   0x2   :  { %9 = vsyncpa [#allocation4 + $0x1], 0  ;;  %s1355_s6 = smov 0   ;;  %s1357_s7 = smov 0  }
   0x3   :  { %s1359_s8 = smov 0   ;;  %s1361_s9 = smov 0  }
   0x4 LB: > { %s1376_s10 = sadd.s32 4294967295, %s1333_s9   ;;  %s1070_s11 = sadd.s32 4294967294, %s1333_s9   ;;  %s1333_s9 = sphi %s1361_s9, %s2097_s9   ;;  %s1329_s8 = sphi %s1359_s8, %s2096_s8   ;;  %s1325_s7 = sphi %s1357_s7, %s2095_s7   ;;  %s1321_s6 = sphi %s1355_s6, %s2094_s6  }
   0x5   : > { %s1380_s12 = sadd.s32 1, %s1333_s9   ;;  %s43_s13 = sadd.s32 1, %s1329_s8 }
   0x6   : > { %s40_s14 = ssub.s32 %s1333_s9, %s1380_s12  ;;  %p53_p0 = scmp.ne.s32.totalorder %s1329_s8, %s1325_s7 }
   0x7   : > { %p41_p1 = scmp.eq.s32.totalorder %s40_s14, 0  ;;  %p54_p2 = scmp.eq.s32.totalorder %s1376_s10, 1 }
   0x8   : > { %p59_p3 = scmp.ne.s32.totalorder %s1325_s7, %s1321_s6  ;;  %p60_p4 = scmp.eq.s32.totalorder %s1070_s11, 1 }
   0x9   : > { %s1391_s15 = scalar_select %p41_p1, %s1329_s8, %s43_s13  }
   0xa   : > { %p1393_p5 = por %p54_p2, %p53_p0  ;;  %p1397_p6 = por %p60_p4, %p59_p3 }
   0xb   : > { %p1071_p7 = scmp.ge.s32.totalorder %s1333_s9, 1  ;;  %p67_p8 = scmp.lt.s32.totalorder %s1333_s9, 3 }
   0xc   : > { %s2073_s16 = scalar_select %p1393_p5, 1, 0 }
   0xd   : > { %s2074_s17 = scalar_select %p1397_p6, 1, 0 }
   0xe   : > { %p2070_p9 = scmp.eq.s32.totalorder %s1376_s10, 0  ;;  %p1404_p10 = pnand %p1071_p7, %p67_p8 }
   0xf   : > { %s1335_s19 = smov [#allocation2]   ;;  %s1239_s24 = scalar_lea.hbm %s2068_s0, 32 }
  0x10   : > { %s2075_s18 = scalar_select %p1404_p10, 1, 0 }
  0x11   : > { %s80_s20 = sshll.u32 %s1335_s19, 4  ;;  %p1155_p11 = pneg %p1404_p10  ;;  %s81_s20 = int_to_ptr.vmem [resolvable:$true] %s80_s20 }
  0x12   : > { %p1240_p13 = scmp.ne.s32.totalorder %s2068_s0, %s1239_s24  ;;  %p1246_p3 = scmp.lt.u32.totalorder %s1239_s24, %s2068_s0 }
  0x13   : > { %p1412_p12 = pnand %p2070_p9, %p1155_p11 }
  0x15   : > { %p1241_p0 = pneg %p1412_p12 }
  0x17   : > { %p1242_p1 = pnand %p1241_p0, %p1240_p13 }
  0x19   : > { %p1243_p2 = pneg %p1242_p1 }
  0x1b   : > { %p1248_p4 = pnand %p1246_p3, %p1243_p2 }
  0x1d   : > { %1251 = shalt.err (!%p1248_p4)
}
  0x1e   : > { %s1252_s29 = scalar_lea.vmem %s81_s20, 32  ;;  %p1260_p9 = scmp.lt.s32.totalorder %s81_s20, %s81_s20 }
  0x1f   : > { %p1253_p7 = scmp.ne.s32.totalorder %s81_s20, %s1252_s29  ;;  %p1261_p6 = scmp.lt.s32.totalorder %s1252_s29, %s1252_s29 }
  0x21   : > { %p1255_p8 = pnand %p1253_p7, %p1241_p0  ;;  %p1262_p5 = por %p1261_p6, %p1260_p9 }
  0x23   : > { %p1256_p11 = pneg %p1255_p8 }
  0x25   : > { %p1263_p10 = pnand %p1262_p5, %p1256_p11 }
  0x27   : > { %1266 = shalt.err (!%p1263_p10)
}
  0x28   : > { %1158 = dma.hbm_to_vmem [thread:$0]  (!%p1412_p12), %s2068_s0, 32, %s81_s20, [#allocation3]  }
  0x29   : > { %p2077_p13 = scmp.ne.s32.totalorder %s2075_s18, 0 }
  0x2a   : > { %p2078_p1 = scmp.eq.s32.totalorder (!%p2077_p13), %s1376_s10, 0 }
  0x2b   : > { %93 = sbr.rel (%p2077_p13) target bundleno = 314 (0x13a), region = 24 }
  0x32   : > { %1312 = dma.done.wait (%p2078_p1), [#allocation3], 32   ;;  %p2079_p0 = pmov %p2078_p1 }
  0x33   : > { %s1076_s3 = sshll.u32 %s1376_s10, 6  ;;  %v110_v0 = vlaneseq  ;;  %v1077_v18 = vld [vmem:[#allocation2] ss:$0 sm:$0xff]  ;;  %v1078_v23 = vld [vmem:[#allocation2 + $0x1] ss:$0 sm:$0xff]  ;;  %s105_s4 = sand.u32 1, %s1325_s7  }
  0x34   : > { %1314 = vsyncadd (%p2079_p0), [#allocation3], 4294967264  ;;  %v119_v2 = vstv %s1076_s3  ;;  %s1075_s5 = sshll.u32 %s105_s4, 6  ;;  %s1116_s13 = sshll.u32 %s1376_s10, 10 }
  0x35   : > { %v111_v1 = vshrl.u32 %v110_v0, 7  ;;  %s1736_s11 = scalar_lea.vmem [#allocation5], %s1075_s5  ;;  %s2020_s20 = scalar_lea.hbm %s2069_s1, %s1116_s13 }
  0x36   : > { %s1008_s14 = sshll.u32 %s1736_s11, 4  ;;  %s2027_s10 = scalar_lea.sflag [#allocation4], %s105_s4  ;;  %s2022_s14 = int_to_ptr.vmem [resolvable:$true] %s1008_s14 }
  0x37   : > { %v112_v3 = vadd.s32 8, %v111_v1  ;;  %v113_v4 = vadd.s32 16, %v111_v1  ;;  %v114_v5 = vadd.s32 24, %v111_v1  ;;  %v115_v6 = vadd.s32 32, %v111_v1  ;;  %s1267_s21 = scalar_lea.vmem %s2022_s14, 1024  ;;  %p2092_p6 = scmp.ne.s32.totalorder %s2073_s16, 0 }
  0x38   : > { %v116_v7 = vadd.s32 40, %v111_v1  ;;  %v117_v8 = vadd.s32 48, %v111_v1  ;;  %v118_v9 = vadd.s32 56, %v111_v1  ;;  %v120_v10 = vadd.s32 %v119_v2, %v111_v1  ;;  %p1268_p5 = scmp.ne.s32.totalorder %s2022_s14, %s1267_s21  ;;  %s1342_s22 = smov [#allocation5]  }
  0x39   : > { %v121_v11 = vadd.s32 %v119_v2, %v112_v3  ;;  %v122_v12 = vadd.s32 %v119_v2, %v113_v4  ;;  %v124_v13 = vadd.s32 %v119_v2, %v115_v6  ;;  %v123_v19 = vadd.s32 %v119_v2, %v114_v5  ;;  %s1271_s23 = sshll.u32 %s1342_s22, 4  ;;  %s1272_s23 = int_to_ptr.vmem [resolvable:$false] %s1271_s23 }
  0x3a   : > { %v125_v14 = vadd.s32 %v119_v2, %v116_v7  ;;  %v126_v15 = vadd.s32 %v119_v2, %v117_v8  ;;  %v127_v16 = vadd.s32 %v119_v2, %v118_v9  ;;  %v128_v17 = vcvt.s32.f32 %v120_v10  ;;  %p1269_p9 = pnand %p1268_p5, %p2092_p6  ;;  %s1273_s24 = scalar_lea.vmem %s1272_s23, 2048 }
  0x3b   : > { %v129_v20 = vcvt.s32.f32 %v121_v11  ;;  %v130_v21 = vcvt.s32.f32 %v122_v12  ;;  %v132_v22 = vcvt.s32.f32 %v124_v13  ;;  %v131_v35 = vcvt.s32.f32 %v123_v19  ;;  %p1274_p12 = scmp.lt.s32.totalorder %s2022_s14, %s1272_s23  ;;  %p1275_p2 = scmp.lt.s32.totalorder %s1273_s24, %s1267_s21 }
  0x3c   : > { %v133_v24 = vcvt.s32.f32 %v125_v14  ;;  %v134_v25 = vcvt.s32.f32 %v126_v15  ;;  %v135_v26 = vcvt.s32.f32 %v127_v16  ;;  %v141_v27 = vmul.f32 %v1077_v18, %v128_v17  ;;  %p1270_p10 = pneg %p1269_p9 }
  0x3d   : > { %v142_v28 = vmul.f32 %v1077_v18, %v129_v20  ;;  %v143_v29 = vmul.f32 %v1077_v18, %v130_v21  ;;  %v145_v30 = vmul.f32 %v1077_v18, %v132_v22  ;;  %v144_v48 = vmul.f32 %v1077_v18, %v131_v35  ;;  %p1276_p3 = por %p1275_p2, %p1274_p12 }
  0x3e   : > { %v146_v31 = vmul.f32 %v1077_v18, %v133_v24  ;;  %v147_v32 = vmul.f32 %v1077_v18, %v134_v25  ;;  %v148_v33 = vmul.f32 %v1077_v18, %v135_v26  ;;  %v1439_v34 = vadd.f32 %v1078_v23, %v141_v27 }
  0x3f   : > { %v1441_v36 = vadd.f32 %v1078_v23, %v142_v28  ;;  %v1443_v37 = vadd.f32 %v1078_v23, %v145_v30  ;;  %v1452_v42 = vadd.f32 %v1078_v23, %v143_v29  ;;  %v1462_v57 = vadd.f32 %v1078_v23, %v144_v48  ;;  %p1277_p4 = pnand %p1276_p3, %p1270_p10 }
  0x40   : > { %v1445_v38 = vadd.f32 %v1078_v23, %v146_v31  ;;  %v1447_v39 = vadd.f32 %v1078_v23, %v147_v32  ;;  %v1449_v40 = vadd.f32 %v1078_v23, %v148_v33  ;;  %v162_v41 = vand.u32 2147483647, %v1439_v34 }
  0x41   : > { %v165_v43 = vand.u32 2139095040, %v1439_v34  ;;  %v265_v44 = vand.u32 2147483647, %v1441_v36  ;;  %v268_v45 = vand.u32 2139095040, %v1441_v36  ;;  %v371_v52 = vand.u32 2139095040, %v1452_v42 }
  0x42   : > { %v169_v47 = vand.u32 8388607, %v162_v41  ;;  %v368_v62 = vand.u32 2147483647, %v1452_v42  ;;  %v474_v6 = vand.u32 2139095040, %v1462_v57  ;;  %vm164_vm13 = vcmp.lt.s32.totalorder %v1439_v34, 0 }
  0x43   : > { %v166_v46 = vshrl.u32 %v165_v43, 23  ;;  %v269_v49 = vshrl.u32 %v268_v45, 23  ;;  %v272_v50 = vand.u32 8388607, %v265_v44  ;;  %v372_v56 = vshrl.u32 %v371_v52, 23 }
  0x44   : > { %v170_v54 = vor.u32 8388608, %v169_v47  ;;  %v1336_v8 = vmov 683565275   ;;  %v1337_v10 = vmov 2475754826  }
  0x45   : > { %v1079_v51 = vadd.s32 4294967169, %v166_v46  ;;  %v1083_v53 = vadd.s32 4294967169, %v269_v49  ;;  %v273_v58 = vor.u32 8388608, %v272_v50  ;;  %v1087_v60 = vadd.s32 4294967169, %v372_v56 }
  0x46   : > { %v1465_v1 = vshll.u32 %v170_v54, 8  ;;  %v1338_v12 = vmov 2131351028   ;;  %v1339_v14 = vmov 2102212464  }
  0x47   : > { %v172_v55 = vadd.s32 1, %v1079_v51  ;;  %v275_v59 = vadd.s32 1, %v1083_v53  ;;  %v1467_v4 = vshll.u32 %v273_v58, 8  ;;  %v1469_v5 = vadd.s32 1, %v1087_v60 }
  0x48   : > { %v1340_v16 = vmov 920167782   ;;  %v1341_v24 = vmov 1326507024  }
  0x49   : > { %vm173_vm0 = vcmp.gt.s32.totalorder %v172_v55, 0  ;;  %vm276_vm1 = vcmp.gt.s32.totalorder %v275_v59, 0  ;;  %vm379_vm11 = vcmp.gt.s32.totalorder %v1469_v5, 0 }
  0x4a   : > { %v174_v61 = vsel %vm173_vm0, %v172_v55, 0  ;;  %v277_v2 = vsel %vm276_vm1, %v275_v59, 0  ;;  %vm1583_vm1 = vcmp.le.f32.partialorder %v162_v41, 0.7853982 }
  0x4b   : > { %v175_v63 = vshrl.u32 %v174_v61, 5  ;;  %v176_v0 = vand.u32 31, %v174_v61  ;;  %v279_v3 = vand.u32 31, %v277_v2  ;;  %v1477_v18 = vshrl.u32 %v277_v2, 5 }
  0x4d   : > { %v177_v7 = vsub.s32 32, %v176_v0  ;;  %v179_v9 = vshll.u32 %v1336_v8, %v176_v0  ;;  %v182_v11 = vshll.u32 %v1337_v10, %v176_v0  ;;  %v185_v13 = vshll.u32 %v1338_v12, %v176_v0 }
  0x4e   : > { %v188_v15 = vshll.u32 %v1339_v14, %v176_v0  ;;  %v191_v17 = vshll.u32 %v1340_v16, %v176_v0  ;;  %vm194_vm2 = vcmp.lt.s32.totalorder %v175_v63, 1  ;;  %vm195_vm3 = vcmp.lt.s32.totalorder %v175_v63, 2 }
  0x4f   : > { %v178_v19 = vshrl.u32 %v1336_v8, %v177_v7  ;;  %v180_v20 = vshrl.u32 %v1337_v10, %v177_v7  ;;  %v183_v21 = vshrl.u32 %v1338_v12, %v177_v7  ;;  %v186_v22 = vshrl.u32 %v1339_v14, %v177_v7 }
  0x50   : > { %v189_v23 = vshrl.u32 %v1340_v16, %v177_v7  ;;  %v192_v25 = vshrl.u32 %v1341_v24, %v177_v7  ;;  %vm197_vm4 = vcmp.lt.s32.totalorder %v175_v63, 4  ;;  %v280_v29 = vsub.s32 32, %v279_v3 }
  0x51   : > { %v181_v26 = vor.u32 %v180_v20, %v179_v9  ;;  %v184_v27 = vor.u32 %v183_v21, %v182_v11  ;;  %v187_v28 = vor.u32 %v186_v22, %v185_v13  ;;  %vm196_vm5 = vcmp.lt.s32.totalorder %v175_v63, 3 }
  0x52   : > { %v190_v30 = vor.u32 %v189_v23, %v188_v15  ;;  %v193_v31 = vor.u32 %v192_v25, %v191_v17  ;;  %v282_v32 = vshll.u32 %v1336_v8, %v279_v3  ;;  %v285_v49 = vshll.u32 %v1337_v10, %v279_v3 }
  0x53   : > { %v198_v33 = vsel %vm194_vm2, %v178_v19, %v181_v26  ;;  %v199_v35 = vsel %vm197_vm4, %v187_v28, 2102212464  ;;  %v202_v43 = vsel %vm194_vm2, %v181_v26, %v184_v27  ;;  %v206_v45 = vsel %vm194_vm2, %v184_v27, %v187_v28 }
  0x54   : > { %v200_v46 = vsel %vm196_vm5, %v184_v27, %v199_v35  ;;  %v203_v47 = vsel %vm197_vm4, %v190_v30, 920167782  ;;  %v207_v48 = vsel %vm197_vm4, %v193_v31, 1326507024  ;;  %v281_v52 = vshrl.u32 %v1336_v8, %v280_v29 }
  0x55   : > { %v204_v50 = vsel %vm196_vm5, %v187_v28, %v203_v47  ;;  %v208_v51 = vsel %vm196_vm5, %v190_v30, %v207_v48  ;;  %v283_v53 = vshrl.u32 %v1337_v10, %v280_v29  ;;  %v201_v54 = vsel %vm195_vm3, %v198_v33, %v200_v46 }
  0x56   : > { %v205_v55 = vsel %vm195_vm3, %v202_v43, %v204_v50  ;;  %v209_v56 = vsel %vm195_vm3, %v206_v45, %v208_v51  ;;  %v286_v58 = vshrl.u32 %v1338_v12, %v280_v29  ;;  %v288_v9 = vshll.u32 %v1338_v12, %v279_v3 }
  0x57   : > { %v1497_v59 = vmul.u32.u64.low %v1465_v1, %v209_v56  ;;  %v1498_v60 = vmul.u32.u64.high %v1465_v1, %v209_v56, %v1497_v59  ;;  %v1501_v61 = vmul.u32.u64.low %v1465_v1, %v205_v55  ;;  %v1502_v0 = vmul.u32.u64.high %v1465_v1, %v205_v55, %v1501_v61 }
  0x58   : > { %v284_v2 = vor.u32 %v283_v53, %v282_v32  ;;  %v287_v7 = vor.u32 %v286_v58, %v285_v49  ;;  %v289_v11 = vshrl.u32 %v1339_v14, %v280_v29  ;;  %v291_v63 = vshll.u32 %v1339_v14, %v279_v3 }
  0x59   : > { %v292_v13 = vshrl.u32 %v1340_v16, %v280_v29  ;;  %v294_v15 = vshll.u32 %v1340_v16, %v279_v3  ;;  %v295_v17 = vshrl.u32 %v1341_v24, %v280_v29  ;;  %v217_v19 = vmul.u32 %v1465_v1, %v201_v54 }
  0x5a   : > { %v290_v20 = vor.u32 %v289_v11, %v288_v9  ;;  %vm297_vm6 = vcmp.lt.s32.totalorder %v1477_v18, 1  ;;  %vm298_vm7 = vcmp.lt.s32.totalorder %v1477_v18, 2  ;;  %vm219_vm8 = vc.u32 %v1498_v60, %v1501_v61 }
  0x5b   : > { %v220_v21 = vadd.s32 1, %v1502_v0  ;;  %v293_v22 = vor.u32 %v292_v13, %v291_v63  ;;  %vm299_vm9 = vcmp.lt.s32.totalorder %v1477_v18, 3  ;;  %v296_v23 = vor.u32 %v295_v17, %v294_v15 }
  0x5c   : > { %vm300_vm10 = vcmp.lt.s32.totalorder %v1477_v18, 4  ;;  %v301_v3 = vsel %vm297_vm6, %v281_v52, %v284_v2  ;;  %v305_v25 = vsel %vm297_vm6, %v284_v2, %v287_v7  ;;  %v309_v28 = vsel %vm297_vm6, %v287_v7, %v290_v20 }
  0x5d   : > { %v221_v1 = vsel %vm219_vm8, %v220_v21, %v1502_v0  ;;  %v302_v26 = vsel %vm300_vm10, %v290_v20, 2102212464  ;;  %v306_v27 = vsel %vm300_vm10, %v293_v22, 920167782  ;;  %v310_v32 = vsel %vm300_vm10, %v296_v23, 1326507024 }
  0x5e   : > { %v222_v29 = vadd.s32 %v221_v1, %v217_v19  ;;  %v303_v30 = vsel %vm299_vm9, %v287_v7, %v302_v26  ;;  %v307_v31 = vsel %vm299_vm9, %v290_v20, %v306_v27  ;;  %v311_v43 = vsel %vm299_vm9, %v293_v22, %v310_v32 }
  0x5f   : > { %v304_v33 = vsel %vm298_vm7, %v301_v3, %v303_v30  ;;  %v308_v35 = vsel %vm298_vm7, %v305_v25, %v307_v31  ;;  %v312_v46 = vsel %vm298_vm7, %v309_v28, %v311_v43  ;;  %v375_v51 = vand.u32 8388607, %v368_v62 }
  0x60   : > { %v223_v45 = vadd.s32 536870912, %v222_v29  ;;  %v1528_v47 = vmul.u32.u64.low %v1467_v4, %v308_v35  ;;  %v1529_v48 = vmul.u32.u64.high %v1467_v4, %v308_v35, %v1528_v47  ;;  %v380_v52 = vsel %vm379_vm11, %v1469_v5, 0 }
  0x61   : > { %v1533_v49 = vmul.u32.u64.low %v1467_v4, %v312_v46  ;;  %v1534_v50 = vmul.u32.u64.high %v1467_v4, %v312_v46, %v1533_v49  ;;  %v382_v54 = vand.u32 31, %v380_v52  ;;  %v320_v18 = vmul.u32 %v1467_v4, %v304_v33 }
  0x62   : > { %v1539_v53 = vshrl.u32 %v223_v45, 30  ;;  %v471_v55 = vand.u32 2147483647, %v1462_v57  ;;  %v475_v56 = vshrl.u32 %v474_v6, 23  ;;  %v323_v59 = vadd.s32 1, %v1529_v48 }
  0x63   : > { %v383_v0 = vsub.s32 32, %v382_v54  ;;  %vm322_vm12 = vc.u32 %v1534_v50, %v1528_v47  ;;  %v376_v2 = vor.u32 8388608, %v375_v51  ;;  %v385_v4 = vshll.u32 %v1336_v8, %v382_v54 }
  0x64   : > { %v225_v58 = vshll.u32 %v1539_v53, 30  ;;  %v324_v7 = vsel %vm322_vm12, %v323_v59, %v1529_v48  ;;  %v1091_v11 = vadd.s32 4294967169, %v475_v56  ;;  %v1555_v6 = vand.u32 8388607, %v471_v55 }
  0x65   : > { %v325_v9 = vadd.s32 %v324_v7, %v320_v18  ;;  %v386_v13 = vshrl.u32 %v1337_v10, %v383_v0  ;;  %v388_v15 = vshll.u32 %v1337_v10, %v382_v54  ;;  %v389_v17 = vshrl.u32 %v1338_v12, %v383_v0 }
  0x66   : > { %v1549_v5 = vsub.s32 %v222_v29, %v225_v58  ;;  %v394_v20 = vshll.u32 %v1339_v14, %v382_v54  ;;  %v1562_v21 = vshll.u32 %v376_v2, 8  ;;  %v381_v23 = vshrl.u32 %v380_v52, 5 }
  0x67   : > { %v326_v19 = vadd.s32 536870912, %v325_v9  ;;  %v391_v3 = vshll.u32 %v1338_v12, %v382_v54  ;;  %v392_v25 = vshrl.u32 %v1339_v14, %v383_v0  ;;  %v218_v1 = vadd.s32 %v1501_v61, %v1498_v60 }
  0x68   : > { %v228_v63 = vsub.s32 0, %v1549_v5  ;;  %v395_v27 = vshrl.u32 %v1340_v16, %v383_v0  ;;  %v479_v28 = vor.u32 8388608, %v1555_v6  ;;  %v387_v30 = vor.u32 %v386_v13, %v385_v4 }
  0x69   : > { %v1569_v26 = vshrl.u32 %v326_v19, 30  ;;  %v390_v31 = vor.u32 %v389_v17, %v388_v15  ;;  %v481_v32 = vadd.s32 1, %v1091_v11  ;;  %v397_v43 = vshll.u32 %v1340_v16, %v382_v54 }
  0x6a   : > { %v1080_v22 = vmin.u32 %v228_v63, %v1549_v5  ;;  %v396_v35 = vor.u32 %v395_v27, %v394_v20  ;;  %v398_v45 = vshrl.u32 %v1341_v24, %v383_v0  ;;  %v393_v61 = vor.u32 %v392_v25, %v391_v3 }
  0x6b   : > { %v328_v33 = vshll.u32 %v1569_v26, 30  ;;  %vm400_vm14 = vcmp.lt.s32.totalorder %v381_v23, 1  ;;  %vm403_vm15 = vcmp.lt.s32.totalorder %v381_v23, 4  ;;  %v248_v46 = vsub.s32 4, %v1539_v53 }
  0x6c   : > { %v230_v29 = vclz %v1080_v22  ;;  %v384_v49 = vshrl.u32 %v1336_v8, %v383_v0  ;;  %vm402_vm0 = vcmp.lt.s32.totalorder %v381_v23, 3  ;;  %vm401_vm3 = vcmp.lt.s32.totalorder %v381_v23, 2 }
  0x6d   : > { %v1578_v48 = vsub.s32 %v325_v9, %v328_v33  ;;  %v405_v52 = vsel %vm403_vm15, %v393_v61, 2102212464  ;;  %v409_v54 = vsel %vm403_vm15, %v396_v35, 920167782  ;;  %v399_v58 = vor.u32 %v398_v45, %v397_v43 }
  0x6e   : > { %v1081_v60 = vadd.s32 4294967294, %v230_v29  ;;  %v408_v59 = vsel %vm400_vm14, %v387_v30, %v390_v31  ;;  %v410_v41 = vsel %vm402_vm0, %v393_v61, %v409_v54  ;;  %v321_v9 = vadd.s32 %v1528_v47, %v1534_v50 }
  0x6f   : > { %v331_v56 = vsub.s32 0, %v1578_v48  ;;  %v404_v11 = vsel %vm400_vm14, %v384_v49, %v387_v30  ;;  %v406_v63 = vsel %vm402_vm0, %v390_v31, %v405_v52  ;;  %v411_v17 = vsel %vm401_vm3, %v408_v59, %v410_v41 }
  0x70   : > { %vm1082_vm2 = vcmp.lt.s32.totalorder %v1081_v60, 0  ;;  %v412_v19 = vsel %vm400_vm14, %v390_v31, %v393_v61  ;;  %v1602_v22 = vmul.u32.u64.low %v1562_v21, %v411_v17  ;;  %v1603_v3 = vmul.u32.u64.high %v1562_v21, %v411_v17, %v1602_v22 }
  0x71   : > { %v233_v18 = vsel %vm1082_vm2, 0, %v1081_v60  ;;  %v1084_v4 = vmin.u32 %v331_v56, %v1578_v48  ;;  %v249_v25 = vsel %vm164_vm13, %v248_v46, %v1539_v53  ;;  %v407_v29 = vsel %vm401_vm3, %v404_v11, %v406_v63 }
  0x72   : > { %v234_v0 = vsub.s32 32, %v233_v18  ;;  %v235_v2 = vshll.u32 %v1549_v5, %v233_v18  ;;  %v238_v7 = vsub.s32 4294967266, %v233_v18  ;;  %v413_v5 = vsel %vm403_vm15, %v399_v58, 1326507024 }
  0x73   : > { %v333_v20 = vclz %v1084_v4  ;;  %vm482_vm4 = vcmp.gt.s32.totalorder %v481_v32, 0  ;;  %v251_v60 = vsel %vm1583_vm1, 0, %v249_v25  ;;  %v426_v53 = vadd.s32 1, %v1603_v3 }
  0x74   : > { %v236_v13 = vshrl.u32 %v218_v1, %v234_v0  ;;  %v239_v15 = vadd.s32 127, %v238_v7  ;;  %v414_v1 = vsel %vm402_vm0, %v396_v35, %v413_v5  ;;  %v483_v61 = vsel %vm482_vm4, %v481_v32, 0 }
  0x75   : > { %v1085_v27 = vadd.s32 4294967294, %v333_v20  ;;  %v415_v30 = vsel %vm401_vm3, %v412_v19, %v414_v1  ;;  %v423_v49 = vmul.u32 %v1562_v21, %v407_v29  ;;  %v485_v23 = vand.u32 31, %v483_v61 }
  0x76   : > { %v237_v47 = vor.u32 %v236_v13, %v235_v2  ;;  %v240_v50 = vshll.u32 %v239_v15, 23  ;;  %v1613_v43 = vmul.u32.u64.low %v1562_v21, %v415_v30  ;;  %v1614_v45 = vmul.u32.u64.high %v1562_v21, %v415_v30, %v1613_v43 }
  0x77   : > { %vm1086_vm5 = vcmp.lt.s32.totalorder %v1085_v27, 0  ;;  %vm267_vm6 = vcmp.lt.s32.totalorder %v1441_v36, 0  ;;  %v486_v58 = vsub.s32 32, %v485_v23  ;;  %v1626_v59 = vshll.u32 %v479_v28, 8 }
  0x78   : > { %v241_v31 = vor.u32 4788187, %v240_v50  ;;  %v244_v33 = vcvt.s32.f32 %v237_v47  ;;  %v336_v46 = vsel %vm1086_vm5, 0, %v1085_v27  ;;  %vm425_vm7 = vc.u32 %v1614_v45, %v1602_v22 }
  0x79   : > { %v337_v52 = vsub.s32 32, %v336_v46  ;;  %v338_v54 = vshll.u32 %v1578_v48, %v336_v46  ;;  %v341_v18 = vsub.s32 4294967266, %v336_v46  ;;  %v1628_v32 = vand.u32 3, %v251_v60 }
  0x7a   : > { %v242_v35 = vand.u32 2147483647, %v241_v31  ;;  %v427_v2 = vsel %vm425_vm7, %v426_v53, %v1603_v3  ;;  %v351_v41 = vsub.s32 4, %v1569_v26  ;;  %v1632_v4 = vshrl.u32 %v483_v61, 5 }
  0x7b   : > { %v339_v0 = vshrl.u32 %v321_v9, %v337_v52  ;;  %v342_v21 = vadd.s32 127, %v341_v18  ;;  %v428_v48 = vadd.s32 %v427_v2, %v423_v49  ;;  %vm1636_vm8 = vcmp.le.f32.partialorder %v265_v44, 0.7853982 }
  0x7c   : > { %v245_v56 = vmul.f32 %v244_v33, %v242_v35  ;;  %v488_v63 = vshll.u32 %v1336_v8, %v485_v23  ;;  %v489_v9 = vshrl.u32 %v1337_v10, %v486_v58  ;;  %v491_v17 = vshll.u32 %v1337_v10, %v485_v23 }
  0x7d   : > { %v340_v6 = vor.u32 %v339_v0, %v338_v54  ;;  %v343_v28 = vshll.u32 %v342_v21, 23  ;;  %v429_v15 = vadd.s32 536870912, %v428_v48  ;;  %v492_v19 = vshrl.u32 %v1338_v12, %v486_v58 }
  0x7e   : > { %v246_v7 = vxor.u32 2147483648, %v245_v56  ;;  %v494_v3 = vshll.u32 %v1338_v12, %v485_v23  ;;  %v495_v50 = vshrl.u32 %v1339_v14, %v486_v58  ;;  %v497_v25 = vshll.u32 %v1339_v14, %v485_v23 }
  0x7f   : > { %v344_v20 = vor.u32 4788187, %v343_v28  ;;  %v347_v5 = vcvt.s32.f32 %v340_v6  ;;  %v1650_v47 = vshrl.u32 %v429_v15, 30  ;;  %v498_v27 = vshrl.u32 %v1340_v16, %v486_v58 }
  0x80   : > { %v247_v13 = vsel %vm164_vm13, %v246_v7, %v245_v56  ;;  %v500_v29 = vshll.u32 %v1340_v16, %v485_v23  ;;  %vm260_vm9 = vcmp.eq.s32.totalorder %v1628_v32, 2  ;;  %v352_v51 = vsel %vm267_vm6, %v351_v41, %v1569_v26 }
  0x81   : > { %v250_v44 = vsel %vm1583_vm1, %v1439_v34, %v247_v13  ;;  %v345_v1 = vand.u32 2147483647, %v344_v20  ;;  %v431_v30 = vshll.u32 %v1650_v47, 30  ;;  %v487_v31 = vshrl.u32 %v1336_v8, %v486_v58 }
  0x82   : > { %1207 = vcosq.f32 %v250_v44  ;;  %v501_v33 = vshrl.u32 %v1341_v24, %v486_v58  ;;  %vm257_vm10 = vcmp.eq.s32.totalorder %v1628_v32, 0  ;;  %v490_v60 = vor.u32 %v489_v9, %v488_v63 }
  0x83   : > { %1209 = vsinq.f32 %v250_v44  ;;  %v348_v43 = vmul.f32 %v347_v5, %v345_v1  ;;  %v493_v53 = vor.u32 %v492_v19, %v491_v17  ;;  %v499_v61 = vor.u32 %v498_v27, %v497_v25 }
  0x84   : > { %vm256_vm11 = vcmp.lt.s32.totalorder %v1628_v32, 2  ;;  %v1665_v35 = vsub.s32 %v428_v48, %v431_v30  ;;  %v496_v46 = vor.u32 %v495_v50, %v494_v3  ;;  %vm503_vm12 = vcmp.lt.s32.totalorder %v1632_v4, 1 }
  0x85   : > { %v577_v26 = vand.u32 2139095040, %v1443_v37  ;;  %vm254_vm13 = vweird.f32 %v1439_v34  ;;  %v349_v49 = vxor.u32 2147483648, %v348_v43  ;;  %v502_v23 = vor.u32 %v501_v33, %v500_v29 }
  0x86   : > { %vm504_vm14 = vcmp.lt.s32.totalorder %v1632_v4, 2  ;;  %vm506_vm15 = vcmp.lt.s32.totalorder %v1632_v4, 4  ;;  %v434_v52 = vsub.s32 0, %v1665_v35  ;;  %vm505_vm0 = vcmp.lt.s32.totalorder %v1632_v4, 3 }
  0x87   : > { %v507_v54 = vsel %vm503_vm12, %v487_v31, %v490_v60  ;;  %v508_v18 = vsel %vm506_vm15, %v496_v46, 2102212464  ;;  %v350_v56 = vsel %vm267_vm6, %v349_v49, %v348_v43  ;;  %v511_v0 = vsel %vm503_vm12, %v490_v60, %v493_v53 }
  0x88   : > { %v509_v58 = vsel %vm505_vm0, %v493_v53, %v508_v18  ;;  %v512_v21 = vsel %vm506_vm15, %v499_v61, 920167782  ;;  %v353_v2 = vsel %vm1636_vm8, %v1441_v36, %v350_v56  ;;  %v354_v7 = vsel %vm1636_vm8, 0, %v352_v51 }
  0x89   : > { %v1088_v41 = vmin.u32 %v434_v52, %v1665_v35  ;;  %v578_v48 = vshrl.u32 %v577_v26, 23  ;;  %1211 = vcosq.f32 %v353_v2  ;;  %v510_v6 = vsel %vm504_vm14, %v507_v54, %v509_v58 }
  0x8a   : > { %v513_v28 = vsel %vm505_vm0, %v496_v46, %v512_v21  ;;  %v515_v63 = vsel %vm503_vm12, %v493_v53, %v496_v46  ;;  %1213 = vsinq.f32 %v353_v2  ;;  %v516_v15 = vsel %vm506_vm15, %v502_v23, 1326507024 }
  0x8b   : > { %v436_v13 = vclz %v1088_v41  ;;  %v514_v11 = vsel %vm504_vm14, %v511_v0, %v513_v28  ;;  %v517_v44 = vsel %vm505_vm0, %v499_v61, %v516_v15  ;;  %v358_v50 = vand.u32 3, %v354_v7 }
  0x8c   : > { %v1208_v9 = vpop.eup %1207  ;;  %v1708_v20 = vmul.u32.u64.low %v1626_v59, %v514_v11  ;;  %v1709_v5 = vmul.u32.u64.high %v1626_v59, %v514_v11, %v1708_v20  ;;  %v518_v1 = vsel %vm504_vm14, %v515_v63, %v517_v44  ;;  %v1095_v30 = vadd.s32 4294967169, %v578_v48 }
  0x8d   : > { %v1210_v17 = vpop.eup %1209  ;;  %v261_v19 = vxor.u32 2147483648, %v1208_v9  ;;  %v1089_v25 = vadd.s32 4294967294, %v436_v13  ;;  %v1717_v29 = vmul.u32.u64.low %v1626_v59, %v518_v1  ;;  %v1718_v51 = vmul.u32.u64.high %v1626_v59, %v518_v1, %v1717_v29 }
  0x8e   : > { %v258_v3 = vxor.u32 2147483648, %v1210_v17  ;;  %vm357_vm1 = vweird.f32 %v1441_v36  ;;  %v424_v33 = vadd.s32 %v1602_v22, %v1614_v45  ;;  %v526_v4 = vmul.u32 %v1626_v59, %v510_v6 }
  0x8f   : > { %v262_v27 = vsel %vm260_vm9, %v261_v19, %v1210_v17  ;;  %vm1090_vm2 = vcmp.lt.s32.totalorder %v1089_v25, 0  ;;  %v529_v53 = vadd.s32 1, %v1709_v5  ;;  %v584_v61 = vadd.s32 1, %v1095_v30 }
  0x90   : > { %v259_v31 = vsel %vm257_vm10, %v1208_v9, %v258_v3  ;;  %v439_v60 = vsel %vm1090_vm2, 0, %v1089_v25  ;;  %vm370_vm3 = vcmp.lt.s32.totalorder %v1452_v42, 0  ;;  %v454_v22 = vsub.s32 4, %v1650_v47 }
  0x91   : > { %v263_v43 = vsel %vm256_vm11, %v259_v31, %v262_v27  ;;  %v440_v26 = vsub.s32 32, %v439_v60  ;;  %v441_v49 = vshll.u32 %v1665_v35, %v439_v60  ;;  %v444_v23 = vsub.s32 4294967266, %v439_v60 }
  0x92   : > { %v264_v46 = vsel %vm254_vm13, nan, %v263_v43  ;;  %vm528_vm4 = vc.u32 %v1718_v51, %v1708_v20  ;;  %vm585_vm5 = vcmp.gt.s32.totalorder %v584_v61, 0  ;;  %vm363_vm6 = vcmp.eq.s32.totalorder %v358_v50, 2 }
  0x93   : > { %986 = vst [vmem:[%s1736_s11] sm:$0xff] %v264_v46  ;;  %v442_v45 = vshrl.u32 %v424_v33, %v440_v26  ;;  %v445_v59 = vadd.s32 127, %v444_v23  ;;  %v530_v34 = vsel %vm528_vm4, %v529_v53, %v1709_v5  ;;  %v586_v32 = vsel %vm585_vm5, %v584_v61, 0  ;;  %v1212_v52 = vpop.eup %1211 }
  0x94   : > { %vm1742_vm7 = vcmp.le.f32.partialorder %v368_v62, 0.7853982  ;;  %v531_v54 = vadd.s32 %v530_v34, %v526_v4  ;;  %v574_v18 = vand.u32 2147483647, %v1443_v37  ;;  %v588_v56 = vand.u32 31, %v586_v32  ;;  %v1214_v58 = vpop.eup %1213 }
  0x95   : > { %vm360_vm8 = vcmp.eq.s32.totalorder %v358_v50, 0  ;;  %v364_v0 = vxor.u32 2147483648, %v1212_v52  ;;  %v443_v21 = vor.u32 %v442_v45, %v441_v49  ;;  %v446_v2 = vshll.u32 %v445_v59, 23 }
  0x96   : > { %vm359_vm9 = vcmp.lt.s32.totalorder %v358_v50, 2  ;;  %v361_v7 = vxor.u32 2147483648, %v1214_v58  ;;  %v532_v41 = vadd.s32 536870912, %v531_v54  ;;  %v589_v48 = vsub.s32 32, %v588_v56 }
  0x97   : > { %v365_v6 = vsel %vm363_vm6, %v364_v0, %v1214_v58  ;;  %v447_v28 = vor.u32 4788187, %v446_v2  ;;  %v450_v63 = vcvt.s32.f32 %v443_v21  ;;  %v455_v62 = vsel %vm370_vm3, %v454_v22, %v1650_v47 }
  0x98   : > { %v362_v9 = vsel %vm360_vm8, %v1212_v52, %v361_v7  ;;  %v1750_v13 = vshrl.u32 %v532_v41, 30  ;;  %v581_v11 = vand.u32 8388607, %v574_v18  ;;  %v591_v15 = vshll.u32 %v1336_v8, %v588_v56 }
  0x99   : > { %v366_v17 = vsel %vm359_vm9, %v362_v9, %v365_v6  ;;  %v448_v19 = vand.u32 2147483647, %v447_v28  ;;  %v592_v44 = vshrl.u32 %v1337_v10, %v589_v48  ;;  %v594_v5 = vshll.u32 %v1337_v10, %v588_v56 }
  0x9a   : > { %v367_v3 = vsel %vm357_vm1, nan, %v366_v17  ;;  %v534_v47 = vshll.u32 %v1750_v13, 30  ;;  %v595_v50 = vshrl.u32 %v1338_v12, %v589_v48  ;;  %v597_v25 = vshll.u32 %v1338_v12, %v588_v56 }
  0x9b   : > { %v451_v1 = vmul.f32 %v450_v63, %v448_v19  ;;  %v587_v27 = vshrl.u32 %v586_v32, 5  ;;  %v598_v29 = vshrl.u32 %v1339_v14, %v589_v48  ;;  %v600_v30 = vshll.u32 %v1339_v14, %v588_v56  ;;  %987 = vst [vmem:[%s1736_s11 + $0x8] sm:$0xff] %v367_v3 }
  0x9c   : > { %v1765_v31 = vsub.s32 %v531_v54, %v534_v47  ;;  %v582_v33 = vor.u32 8388608, %v581_v11  ;;  %v601_v4 = vshrl.u32 %v1340_v16, %v589_v48  ;;  %v603_v36 = vshll.u32 %v1340_v16, %v588_v56 }
  0x9d   : > { %v452_v43 = vxor.u32 2147483648, %v451_v1  ;;  %v457_v60 = vsel %vm1742_vm7, 0, %v455_v62  ;;  %v590_v53 = vshrl.u32 %v1336_v8, %v589_v48  ;;  %v604_v61 = vshrl.u32 %v1341_v24, %v589_v48 }
  0x9e   : > { %v537_v46 = vsub.s32 0, %v1765_v31  ;;  %v593_v26 = vor.u32 %v592_v44, %v591_v15  ;;  %v596_v49 = vor.u32 %v595_v50, %v594_v5  ;;  %v599_v23 = vor.u32 %v598_v29, %v597_v25 }
  0x9f   : > { %v453_v22 = vsel %vm370_vm3, %v452_v43, %v451_v1  ;;  %v602_v45 = vor.u32 %v601_v4, %v600_v30  ;;  %v605_v59 = vor.u32 %v604_v61, %v603_v36  ;;  %vm606_vm10 = vcmp.lt.s32.totalorder %v587_v27, 1 }
  0xa0   : > { %v456_v34 = vsel %vm1742_vm7, %v1452_v42, %v453_v22  ;;  %v1092_v32 = vmin.u32 %v537_v46, %v1765_v31  ;;  %vm607_vm11 = vcmp.lt.s32.totalorder %v587_v27, 2  ;;  %v622_v52 = vshll.u32 %v582_v33, 8 }
  0xa1   : > { %1215 = vcosq.f32 %v456_v34  ;;  %vm608_vm12 = vcmp.lt.s32.totalorder %v587_v27, 3  ;;  %vm609_vm13 = vcmp.lt.s32.totalorder %v587_v27, 4  ;;  %v610_v54 = vsel %vm606_vm10, %v590_v53, %v593_v26 }
  0xa2   : > { %1217 = vsinq.f32 %v456_v34  ;;  %v539_v56 = vclz %v1092_v32  ;;  %v611_v58 = vsel %vm609_vm13, %v599_v23, 2102212464  ;;  %v614_v0 = vsel %vm606_vm10, %v593_v26, %v596_v49 }
  0xa3   : > { %v612_v21 = vsel %vm608_vm12, %v596_v49, %v611_v58  ;;  %v615_v2 = vsel %vm609_vm13, %v602_v45, 920167782  ;;  %v618_v7 = vsel %vm606_vm10, %v596_v49, %v599_v23  ;;  %v619_v41 = vsel %vm609_vm13, %v605_v59, 1326507024 }
  0xa4   : > { %v1093_v48 = vadd.s32 4294967294, %v539_v56  ;;  %v616_v6 = vsel %vm608_vm12, %v599_v23, %v615_v2  ;;  %v620_v35 = vsel %vm608_vm12, %v602_v45, %v619_v41  ;;  %v461_v28 = vand.u32 3, %v457_v60 }
  0xa5   : > { %v527_v63 = vadd.s32 %v1708_v20, %v1718_v51  ;;  %v617_v62 = vsel %vm607_vm11, %v614_v0, %v616_v6  ;;  %v621_v9 = vsel %vm607_vm11, %v618_v7, %v620_v35  ;;  %vm460_vm14 = vweird.f32 %v1452_v42 }
  0xa6   : > { %vm1094_vm15 = vcmp.lt.s32.totalorder %v1093_v48, 0  ;;  %v613_v11 = vsel %vm607_vm11, %v610_v54, %v612_v21  ;;  %v1786_v15 = vmul.u32.u64.low %v622_v52, %v621_v9  ;;  %v1787_v17 = vmul.u32.u64.high %v622_v52, %v621_v9, %v1786_v15 }
  0xa7   : > { %v542_v19 = vsel %vm1094_vm15, 0, %v1093_v48  ;;  %v1789_v44 = vmul.u32.u64.low %v622_v52, %v617_v62  ;;  %v1790_v5 = vmul.u32.u64.high %v622_v52, %v617_v62, %v1789_v44  ;;  %v680_v3 = vand.u32 2139095040, %v1445_v38 }
  0xa8   : > { %v543_v20 = vsub.s32 32, %v542_v19  ;;  %v544_v51 = vshll.u32 %v1765_v31, %v542_v19  ;;  %v547_v47 = vsub.s32 4294967266, %v542_v19  ;;  %v557_v50 = vsub.s32 4, %v1750_v13 }
  0xa9   : > { %vm463_vm0 = vcmp.eq.s32.totalorder %v461_v28, 0  ;;  %vm1798_vm1 = vcmp.le.f32.partialorder %v471_v55, 0.7853982  ;;  %vm473_vm2 = vcmp.lt.s32.totalorder %v1462_v57, 0  ;;  %v681_v1 = vshrl.u32 %v680_v3, 23 }
  0xaa   : > { %v545_v27 = vshrl.u32 %v527_v63, %v543_v20  ;;  %v548_v29 = vadd.s32 127, %v547_v47  ;;  %v629_v30 = vmul.u32 %v622_v52, %v613_v11  ;;  %vm631_vm3 = vc.u32 %v1787_v17, %v1789_v44 }
  0xab   : > { %v1216_v31 = vpop.eup %1215  ;;  %vm466_vm4 = vcmp.eq.s32.totalorder %v461_v28, 2  ;;  %v632_v33 = vadd.s32 1, %v1790_v5  ;;  %v677_v4 = vand.u32 2147483647, %v1445_v38  ;;  %v1099_v36 = vadd.s32 4294967169, %v681_v1 }
  0xac   : > { %v1218_v55 = vpop.eup %1217  ;;  %v467_v43 = vxor.u32 2147483648, %v1216_v31  ;;  %v546_v60 = vor.u32 %v545_v27, %v544_v51  ;;  %v549_v53 = vshll.u32 %v548_v29, 23  ;;  %v558_v61 = vsel %vm473_vm2, %v557_v50, %v1750_v13 }
  0xad   : > { %vm462_vm5 = vcmp.lt.s32.totalorder %v461_v28, 2  ;;  %v464_v46 = vxor.u32 2147483648, %v1218_v55  ;;  %v633_v26 = vsel %vm631_vm3, %v632_v33, %v1790_v5  ;;  %v687_v49 = vadd.s32 1, %v1099_v36 }
  0xae   : > { %v468_v23 = vsel %vm466_vm4, %v467_v43, %v1218_v55  ;;  %v550_v22 = vor.u32 4788187, %v549_v53  ;;  %v553_v45 = vcvt.s32.f32 %v546_v60  ;;  %v634_v59 = vadd.s32 %v633_v26, %v629_v30 }
  0xaf   : > { %v465_v34 = vsel %vm463_vm0, %v1216_v31, %v464_v46  ;;  %v560_v32 = vsel %vm1798_vm1, 0, %v558_v61  ;;  %v684_v52 = vand.u32 8388607, %v677_v4  ;;  %vm688_vm6 = vcmp.gt.s32.totalorder %v687_v49, 0 }
  0xb0   : > { %v469_v13 = vsel %vm462_vm5, %v465_v34, %v468_v23  ;;  %v551_v54 = vand.u32 2147483647, %v550_v22  ;;  %v635_v56 = vadd.s32 536870912, %v634_v59  ;;  %v689_v58 = vsel %vm688_vm6, %v687_v49, 0 }
  0xb1   : > { %v470_v0 = vsel %vm460_vm14, nan, %v469_v13  ;;  %v691_v21 = vand.u32 31, %v689_v58  ;;  %v783_v41 = vand.u32 2139095040, %v1447_v39  ;;  %v1822_v48 = vand.u32 3, %v560_v32 }
  0xb2   : > { %v554_v2 = vmul.f32 %v553_v45, %v551_v54  ;;  %v1818_v7 = vshrl.u32 %v635_v56, 30  ;;  %988 = vst [vmem:[%s1736_s11 + $0x10] sm:$0xff] %v470_v0  ;;  %v685_v6 = vor.u32 8388608, %v684_v52  ;;  %v690_v1 = vshrl.u32 %v689_v58, 5 }
  0xb3   : > { %v692_v35 = vsub.s32 32, %v691_v21  ;;  %v694_v28 = vshll.u32 %v1336_v8, %v691_v21  ;;  %v697_v9 = vshll.u32 %v1337_v10, %v691_v21  ;;  %v700_v42 = vshll.u32 %v1338_v12, %v691_v21 }
  0xb4   : > { %v555_v63 = vxor.u32 2147483648, %v554_v2  ;;  %v637_v62 = vshll.u32 %v1818_v7, 30  ;;  %v703_v5 = vshll.u32 %v1339_v14, %v691_v21  ;;  %v784_v47 = vshrl.u32 %v783_v41, 23 }
  0xb5   : > { %v695_v11 = vshrl.u32 %v1337_v10, %v692_v35  ;;  %v698_v15 = vshrl.u32 %v1338_v12, %v692_v35  ;;  %v701_v19 = vshrl.u32 %v1339_v14, %v692_v35  ;;  %v704_v51 = vshrl.u32 %v1340_v16, %v692_v35 }
  0xb6   : > { %v556_v3 = vsel %vm473_vm2, %v555_v63, %v554_v2  ;;  %v1834_v20 = vsub.s32 %v634_v59, %v637_v62  ;;  %v693_v27 = vshrl.u32 %v1336_v8, %v692_v35  ;;  %v706_v55 = vshll.u32 %v1340_v16, %v691_v21 }
  0xb7   : > { %v559_v50 = vsel %vm1798_vm1, %v1462_v57, %v556_v3  ;;  %v696_v29 = vor.u32 %v695_v11, %v694_v28  ;;  %v699_v31 = vor.u32 %v698_v15, %v697_v9  ;;  %v702_v33 = vor.u32 %v701_v19, %v700_v42 }
  0xb8   : > { %1219 = vcosq.f32 %v559_v50  ;;  %v640_v30 = vsub.s32 0, %v1834_v20  ;;  %v705_v36 = vor.u32 %v704_v51, %v703_v5  ;;  %v707_v43 = vshrl.u32 %v1341_v24, %v692_v35 }
  0xb9   : > { %1221 = vsinq.f32 %v559_v50  ;;  %vm569_vm7 = vcmp.eq.s32.totalorder %v1822_v48, 2  ;;  %v1846_v60 = vshll.u32 %v685_v6, 8  ;;  %v780_v53 = vand.u32 2147483647, %v1447_v39 }
  0xba   : > { %v1096_v25 = vmin.u32 %v640_v30, %v1834_v20  ;;  %v1103_v61 = vadd.s32 4294967169, %v784_v47  ;;  %vm566_vm8 = vcmp.eq.s32.totalorder %v1822_v48, 0  ;;  %v708_v46 = vor.u32 %v707_v43, %v706_v55 }
  0xbb   : > { %vm709_vm9 = vcmp.lt.s32.totalorder %v690_v1, 1  ;;  %vm710_vm10 = vcmp.lt.s32.totalorder %v690_v1, 2  ;;  %vm711_vm11 = vcmp.lt.s32.totalorder %v690_v1, 3  ;;  %vm565_vm12 = vcmp.lt.s32.totalorder %v1822_v48, 2 }
  0xbc   : > { %v642_v26 = vclz %v1096_v25  ;;  %vm712_vm13 = vcmp.lt.s32.totalorder %v690_v1, 4  ;;  %v713_v49 = vsel %vm709_vm9, %v693_v27, %v696_v29  ;;  %v717_v23 = vsel %vm709_vm9, %v696_v29, %v699_v31 }
  0xbd   : > { %vm563_vm14 = vweird.f32 %v1462_v57  ;;  %v714_v22 = vsel %vm712_vm13, %v702_v33, 2102212464  ;;  %v718_v45 = vsel %vm712_vm13, %v705_v36, 920167782  ;;  %v721_v59 = vsel %vm709_vm9, %v699_v31, %v702_v33 }
  0xbe   : > { %v722_v34 = vsel %vm712_vm13, %v708_v46, 1326507024  ;;  %v1097_v32 = vadd.s32 4294967294, %v642_v26  ;;  %v715_v52 = vsel %vm711_vm11, %v699_v31, %v714_v22  ;;  %v719_v13 = vsel %vm711_vm11, %v702_v33, %v718_v45 }
  0xbf   : > { %v723_v54 = vsel %vm711_vm11, %v705_v36, %v722_v34  ;;  %v630_v56 = vadd.s32 %v1789_v44, %v1787_v17  ;;  %v720_v58 = vsel %vm710_vm10, %v717_v23, %v719_v13  ;;  %v790_v21 = vadd.s32 1, %v1103_v61 }
  0xc0   : > { %v724_v0 = vsel %vm710_vm10, %v721_v59, %v723_v54  ;;  %vm1098_vm15 = vcmp.lt.s32.totalorder %v1097_v32, 0  ;;  %v716_v2 = vsel %vm710_vm10, %v713_v49, %v715_v52  ;;  %v660_v19 = vsub.s32 4, %v1818_v7 }
  0xc1   : > { %v1858_v41 = vmul.u32.u64.low %v1846_v60, %v724_v0  ;;  %v1859_v6 = vmul.u32.u64.high %v1846_v60, %v724_v0, %v1858_v41  ;;  %v645_v35 = vsel %vm1098_vm15, 0, %v1097_v32  ;;  %vm791_vm0 = vcmp.gt.s32.totalorder %v790_v21, 0 }
  0xc2   : > { %v1862_v28 = vmul.u32.u64.low %v1846_v60, %v720_v58  ;;  %v1863_v63 = vmul.u32.u64.high %v1846_v60, %v720_v58, %v1862_v28  ;;  %v1220_v17 = vpop.eup %1219  ;;  %v646_v44 = vsub.s32 32, %v645_v35  ;;  %v647_v62 = vshll.u32 %v1834_v20, %v645_v35 }
  0xc3   : > { %v650_v9 = vsub.s32 4294967266, %v645_v35  ;;  %v792_v42 = vsel %vm791_vm0, %v790_v21, 0  ;;  %v1222_v11 = vpop.eup %1221  ;;  %v570_v15 = vxor.u32 2147483648, %v1220_v17  ;;  %v787_v5 = vand.u32 8388607, %v780_v53 }
  0xc4   : > { %v794_v3 = vand.u32 31, %v792_v42  ;;  %v567_v51 = vxor.u32 2147483648, %v1222_v11  ;;  %vm576_vm1 = vcmp.lt.s32.totalorder %v1443_v37, 0  ;;  %v648_v47 = vshrl.u32 %v630_v56, %v646_v44 }
  0xc5   : > { %v651_v50 = vadd.s32 127, %v650_v9  ;;  %v732_v1 = vmul.u32 %v1846_v60, %v716_v2  ;;  %v571_v20 = vsel %vm569_vm7, %v570_v15, %v1222_v11  ;;  %vm734_vm2 = vc.u32 %v1859_v6, %v1862_v28 }
  0xc6   : > { %v735_v27 = vadd.s32 1, %v1863_v63  ;;  %v795_v29 = vsub.s32 32, %v794_v3  ;;  %v568_v30 = vsel %vm566_vm8, %v1220_v17, %v567_v51  ;;  %vm1881_vm3 = vcmp.le.f32.partialorder %v574_v18, 0.7853982 }
  0xc7   : > { %v649_v33 = vor.u32 %v648_v47, %v647_v62  ;;  %v652_v36 = vshll.u32 %v651_v50, 23  ;;  %v797_v55 = vshll.u32 %v1336_v8, %v794_v3  ;;  %v572_v43 = vsel %vm565_vm12, %v568_v30, %v571_v20 }
  0xc8   : > { %v736_v25 = vsel %vm734_vm2, %v735_v27, %v1863_v63  ;;  %v793_v60 = vshrl.u32 %v792_v42, 5  ;;  %v798_v61 = vshrl.u32 %v1337_v10, %v795_v29  ;;  %v573_v46 = vsel %vm563_vm14, nan, %v572_v43 }
  0xc9   : > { %v653_v18 = vor.u32 4788187, %v652_v36  ;;  %v656_v26 = vcvt.s32.f32 %v649_v33  ;;  %v737_v49 = vadd.s32 %v736_v25, %v732_v1  ;;  %v800_v22 = vshll.u32 %v1337_v10, %v794_v3  ;;  %989 = vst [vmem:[%s1736_s11 + $0x18] sm:$0xff] %v573_v46 }
  0xca   : > { %v799_v23 = vor.u32 %v798_v61, %v797_v55  ;;  %v801_v45 = vshrl.u32 %v1338_v12, %v795_v29  ;;  %v803_v59 = vshll.u32 %v1338_v12, %v794_v3  ;;  %v804_v32 = vshrl.u32 %v1339_v14, %v795_v29 }
  0xcb   : > { %v654_v48 = vand.u32 2147483647, %v653_v18  ;;  %v738_v34 = vadd.s32 536870912, %v737_v49  ;;  %v806_v52 = vshll.u32 %v1339_v14, %v794_v3  ;;  %v807_v57 = vshrl.u32 %v1340_v16, %v795_v29 }
  0xcc   : > { %v802_v13 = vor.u32 %v801_v45, %v800_v22  ;;  %v809_v54 = vshll.u32 %v1340_v16, %v794_v3  ;;  %v810_v56 = vshrl.u32 %v1341_v24, %v795_v29  ;;  %v788_v21 = vor.u32 8388608, %v787_v5 }
  0xcd   : > { %v657_v58 = vmul.f32 %v656_v26, %v654_v48  ;;  %v1901_v0 = vshrl.u32 %v738_v34, 30  ;;  %vm812_vm4 = vcmp.lt.s32.totalorder %v793_v60, 1  ;;  %v661_v2 = vsel %vm576_vm1, %v660_v19, %v1818_v7 }
  0xce   : > { %v796_v41 = vshrl.u32 %v1336_v8, %v795_v29  ;;  %v805_v35 = vor.u32 %v804_v32, %v803_v59  ;;  %v808_v63 = vor.u32 %v807_v57, %v806_v52  ;;  %vm814_vm5 = vcmp.lt.s32.totalorder %v793_v60, 3 }
  0xcf   : > { %v658_v17 = vxor.u32 2147483648, %v657_v58  ;;  %v740_v44 = vshll.u32 %v1901_v0, 30  ;;  %vm815_vm6 = vcmp.lt.s32.totalorder %v793_v60, 4  ;;  %v811_v62 = vor.u32 %v810_v56, %v809_v54 }
  0xd0   : > { %vm813_vm7 = vcmp.lt.s32.totalorder %v793_v60, 2  ;;  %v820_v9 = vsel %vm812_vm4, %v799_v23, %v802_v13  ;;  %v821_v42 = vsel %vm815_vm6, %v808_v63, 920167782  ;;  %v817_v7 = vsel %vm815_vm6, %v805_v35, 2102212464 }
  0xd1   : > { %v659_v11 = vsel %vm576_vm1, %v658_v17, %v657_v58  ;;  %v741_v15 = vsub.s32 %v737_v49, %v740_v44  ;;  %v663_v5 = vsel %vm1881_vm3, 0, %v661_v2  ;;  %v822_v3 = vsel %vm814_vm5, %v805_v35, %v821_v42 }
  0xd2   : > { %v662_v19 = vsel %vm1881_vm3, %v1443_v37, %v659_v11  ;;  %v828_v51 = vshll.u32 %v788_v21, 8  ;;  %v816_v50 = vsel %vm812_vm4, %v796_v41, %v799_v23  ;;  %v823_v1 = vsel %vm813_vm7, %v820_v9, %v822_v3 }
  0xd3   : > { %1223 = vcosq.f32 %v662_v19  ;;  %v743_v47 = vsub.s32 0, %v741_v15  ;;  %v818_v20 = vsel %vm814_vm5, %v802_v13, %v817_v7  ;;  %v824_v27 = vsel %vm812_vm4, %v802_v13, %v805_v35 }
  0xd4   : > { %1225 = vsinq.f32 %v662_v19  ;;  %v825_v29 = vsel %vm815_vm6, %v811_v62, 1326507024  ;;  %v667_v33 = vand.u32 3, %v663_v5  ;;  %v819_v25 = vsel %vm813_vm7, %v816_v50, %v818_v20 }
  0xd5   : > { %v1100_v30 = vmin.u32 %v743_v47, %v741_v15  ;;  %v826_v31 = vsel %vm814_vm5, %v808_v63, %v825_v29  ;;  %v1925_v36 = vmul.u32.u64.low %v828_v51, %v823_v1  ;;  %v1926_v55 = vmul.u32.u64.high %v828_v51, %v823_v1, %v1925_v36 }
  0xd6   : > { %v827_v61 = vsel %vm813_vm7, %v824_v27, %v826_v31  ;;  %v886_v46 = vand.u32 2139095040, %v1449_v40  ;;  %vm666_vm8 = vweird.f32 %v1443_v37  ;;  %v835_v22 = vmul.u32 %v828_v51, %v819_v25 }
  0xd7   : > { %v745_v43 = vclz %v1100_v30  ;;  %v1932_v18 = vmul.u32.u64.low %v828_v51, %v827_v61  ;;  %v1933_v26 = vmul.u32.u64.high %v828_v51, %v827_v61, %v1932_v18  ;;  %v838_v45 = vadd.s32 1, %v1926_v55 }
  0xd8   : > { %v887_v23 = vshrl.u32 %v886_v46, 23  ;;  %vm668_vm9 = vcmp.lt.s32.totalorder %v667_v33, 2  ;;  %v733_v59 = vadd.s32 %v1862_v28, %v1859_v6  ;;  %vm672_vm11 = vcmp.eq.s32.totalorder %v667_v33, 2 }
  0xd9   : > { %v1101_v49 = vadd.s32 4294967294, %v745_v43  ;;  %vm837_vm12 = vc.u32 %v1933_v26, %v1925_v36  ;;  %v883_v34 = vand.u32 2147483647, %v1449_v40  ;;  %vm669_vm13 = vcmp.eq.s32.totalorder %v667_v33, 0 }
  0xda   : > { %v1107_v48 = vadd.s32 4294967169, %v887_v23  ;;  %v839_v54 = vsel %vm837_vm12, %v838_v45, %v1926_v55  ;;  %v763_v35 = vsub.s32 4, %v1901_v0  ;;  %vm679_vm15 = vcmp.lt.s32.totalorder %v1445_v38, 0 }
  0xdb   : > { %vm1102_vm10 = vcmp.lt.s32.totalorder %v1101_v49, 0  ;;  %v840_v21 = vadd.s32 %v839_v54, %v835_v22  ;;  %v890_v44 = vand.u32 8388607, %v883_v34  ;;  %vm1955_vm0 = vcmp.le.f32.partialorder %v677_v4, 0.7853982 }
  0xdc   : > { %v748_v60 = vsel %vm1102_vm10, 0, %v1101_v49  ;;  %v893_v6 = vadd.s32 1, %v1107_v48  ;;  %v764_v50 = vsel %vm679_vm15, %v763_v35, %v1901_v0  ;;  %vm769_vm10 = vweird.f32 %v1445_v38 }
  0xdd   : > { %v1224_v32 = vpop.eup %1223  ;;  %v749_v52 = vsub.s32 32, %v748_v60  ;;  %v750_v13 = vshll.u32 %v741_v15, %v748_v60  ;;  %v753_v57 = vsub.s32 4294967266, %v748_v60  ;;  %v841_v17 = vadd.s32 536870912, %v840_v21 }
  0xde   : > { %v1226_v56 = vpop.eup %1225  ;;  %v673_v58 = vxor.u32 2147483648, %v1224_v32  ;;  %vm894_vm14 = vcmp.gt.s32.totalorder %v893_v6, 0  ;;  %v891_v27 = vor.u32 8388608, %v890_v44  ;;  %v766_v46 = vsel %vm1955_vm0, 0, %v764_v50 }
  0xdf   : > { %v670_v28 = vxor.u32 2147483648, %v1226_v56  ;;  %v751_v2 = vshrl.u32 %v733_v59, %v749_v52  ;;  %v754_v41 = vadd.s32 127, %v753_v57  ;;  %v895_v11 = vsel %vm894_vm14, %v893_v6, 0 }
  0xe0   : > { %v674_v63 = vsel %vm672_vm11, %v673_v58, %v1226_v56  ;;  %v1948_v7 = vshrl.u32 %v841_v17, 30  ;;  %v897_v19 = vand.u32 31, %v895_v11  ;;  %v896_v29 = vshrl.u32 %v895_v11, 5 }
  0xe1   : > { %v671_v62 = vsel %vm669_vm13, %v1224_v32, %v670_v28  ;;  %v752_v9 = vor.u32 %v751_v2, %v750_v13  ;;  %v755_v42 = vshll.u32 %v754_v41, 23  ;;  %v931_v45 = vshll.u32 %v891_v27, 8 }
  0xe2   : > { %v675_v15 = vsel %vm668_vm9, %v671_v62, %v674_v63  ;;  %v843_v1 = vshll.u32 %v1948_v7, 30  ;;  %v898_v20 = vsub.s32 32, %v897_v19  ;;  %v900_v30 = vshll.u32 %v1336_v8, %v897_v19 }
  0xe3   : > { %v676_v5 = vsel %vm666_vm8, nan, %v675_v15  ;;  %v756_v3 = vor.u32 4788187, %v755_v42  ;;  %v759_v51 = vcvt.s32.f32 %v752_v9  ;;  %v903_v4 = vshll.u32 %v1337_v10, %v897_v19 }
  0xe4   : > { %990 = vst [vmem:[%s1736_s11 + $0x20] sm:$0xff] %v676_v5  ;;  %v844_v33 = vsub.s32 %v840_v21, %v843_v1  ;;  %v901_v31 = vshrl.u32 %v1337_v10, %v898_v20  ;;  %v906_v55 = vshll.u32 %v1338_v12, %v897_v19  ;;  %v904_v25 = vshrl.u32 %v1338_v12, %v898_v20 }
  0xe5   : > { %v757_v37 = vand.u32 2147483647, %v756_v3  ;;  %v907_v0 = vshrl.u32 %v1339_v14, %v898_v20  ;;  %v909_v61 = vshll.u32 %v1339_v14, %v897_v19  ;;  %v910_v49 = vshrl.u32 %v1340_v16, %v898_v20 }
  0xe6   : > { %v846_v18 = vsub.s32 0, %v844_v33  ;;  %v899_v22 = vshrl.u32 %v1336_v8, %v898_v20  ;;  %v912_v10 = vshll.u32 %v1340_v16, %v897_v19  ;;  %v902_v48 = vor.u32 %v901_v31, %v900_v30 }
  0xe7   : > { %v760_v43 = vmul.f32 %v759_v51, %v757_v37  ;;  %v905_v60 = vor.u32 %v904_v25, %v903_v4  ;;  %v908_v12 = vor.u32 %v907_v0, %v906_v55  ;;  %v911_v14 = vor.u32 %v910_v49, %v909_v61 }
  0xe8   : > { %v1104_v59 = vmin.u32 %v846_v18, %v844_v33  ;;  %v913_v52 = vshrl.u32 %v1341_v24, %v898_v20  ;;  %vm915_vm1 = vcmp.lt.s32.totalorder %v896_v29, 1  ;;  %vm916_vm2 = vcmp.lt.s32.totalorder %v896_v29, 2 }
  0xe9   : > { %v761_v23 = vxor.u32 2147483648, %v760_v43  ;;  %vm917_vm3 = vcmp.lt.s32.totalorder %v896_v29, 3  ;;  %vm918_vm4 = vcmp.lt.s32.totalorder %v896_v29, 4  ;;  %v919_v16 = vsel %vm915_vm1, %v899_v22, %v902_v48 }
  0xea   : > { %v848_v57 = vclz %v1104_v59  ;;  %v914_v8 = vor.u32 %v913_v52, %v912_v10  ;;  %v920_v56 = vsel %vm918_vm4, %v908_v12, 2102212464  ;;  %v923_v58 = vsel %vm915_vm1, %v902_v48, %v905_v60 }
  0xeb   : > { %v762_v32 = vsel %vm679_vm15, %v761_v23, %v760_v43  ;;  %v921_v21 = vsel %vm917_vm3, %v905_v60, %v920_v56  ;;  %v924_v6 = vsel %vm918_vm4, %v911_v14, 920167782  ;;  %v927_v24 = vsel %vm915_vm1, %v905_v60, %v908_v12 }
  0xec   : > { %v765_v13 = vsel %vm1955_vm0, %v1445_v38, %v762_v32  ;;  %v1105_v54 = vadd.s32 4294967294, %v848_v57  ;;  %v928_v28 = vsel %vm918_vm4, %v914_v8, 1326507024  ;;  %v836_v2 = vadd.s32 %v1925_v36, %v1933_v26 }
  0xed   : > { %1227 = vcosq.f32 %v765_v13  ;;  %v925_v41 = vsel %vm917_vm3, %v908_v12, %v924_v6  ;;  %v929_v35 = vsel %vm917_vm3, %v911_v14, %v928_v28  ;;  %v770_v63 = vand.u32 3, %v766_v46 }
  0xee   : > { %1229 = vsinq.f32 %v765_v13  ;;  %vm1106_vm5 = vcmp.lt.s32.totalorder %v1105_v54, 0  ;;  %v926_v44 = vsel %vm916_vm2, %v923_v58, %v925_v41  ;;  %v930_v62 = vsel %vm916_vm2, %v927_v24, %v929_v35 }
  0xef   : > { %v851_v17 = vsel %vm1106_vm5, 0, %v1105_v54  ;;  %v922_v15 = vsel %vm916_vm2, %v919_v16, %v921_v21  ;;  %v1990_v19 = vmul.u32.u64.low %v931_v45, %v930_v62  ;;  %v1991_v5 = vmul.u32.u64.high %v931_v45, %v930_v62, %v1990_v19 }
  0xf0   : > { %v852_v9 = vsub.s32 32, %v851_v17  ;;  %v853_v42 = vshll.u32 %v844_v33, %v851_v17  ;;  %v856_v11 = vsub.s32 4294967266, %v851_v17  ;;  %v938_v1 = vmul.u32 %v931_v45, %v922_v15 }
  0xf1   : > { %v1993_v36 = vmul.u32.u64.low %v931_v45, %v926_v44  ;;  %v1994_v26 = vmul.u32.u64.high %v931_v45, %v926_v44, %v1993_v36  ;;  %vm775_vm6 = vcmp.eq.s32.totalorder %v770_v63, 2  ;;  %vm772_vm8 = vcmp.eq.s32.totalorder %v770_v63, 0 }
  0xf2   : > { %v854_v3 = vshrl.u32 %v836_v2, %v852_v9  ;;  %v857_v51 = vadd.s32 127, %v856_v11  ;;  %vm771_vm9 = vcmp.lt.s32.totalorder %v770_v63, 2  ;;  %vm782_vm11 = vcmp.lt.s32.totalorder %v1447_v39, 0 }
  0xf3   : > { %vm940_vm7 = vc.u32 %v1991_v5, %v1993_v36  ;;  %v941_v37 = vadd.s32 1, %v1994_v26  ;;  %vm781_vm12 = vcmp.le.f32.partialorder %v780_v53, 0.7853982  ;;  %v866_v22 = vsub.s32 4, %v1948_v7 }
  0xf4   : > { %v855_v47 = vor.u32 %v854_v3, %v853_v42  ;;  %v858_v50 = vshll.u32 %v857_v51, 23  ;;  %v939_v8 = vadd.s32 %v1993_v36, %v1991_v5  ;;  %vm872_vm1 = vweird.f32 %v1447_v39 }
  0xf5   : > { %v942_v4 = vsel %vm940_vm7, %v941_v37, %v1994_v26  ;;  %v867_v48 = vsel %vm782_vm11, %v866_v22, %v1948_v7  ;;  %vm885_vm2 = vcmp.lt.s32.totalorder %v1449_v40, 0  ;;  %vm884_vm3 = vcmp.le.f32.partialorder %v883_v34, 0.7853982 }
  0xf6   : > { %v859_v30 = vor.u32 4788187, %v858_v50  ;;  %v862_v33 = vcvt.s32.f32 %v855_v47  ;;  %v943_v25 = vadd.s32 %v942_v4, %v938_v1  ;;  %v869_v32 = vsel %vm781_vm12, 0, %v867_v48 }
  0xf7   : > { %v1228_v20 = vpop.eup %1227  ;;  %v873_v52 = vand.u32 3, %v869_v32  ;;  %vm975_vm7 = vweird.f32 %v1449_v40 }
  0xf8   : > { %v1230_v27 = vpop.eup %1229  ;;  %v776_v29 = vxor.u32 2147483648, %v1228_v20  ;;  %v860_v43 = vand.u32 2147483647, %v859_v30  ;;  %v944_v18 = vadd.s32 536870912, %v943_v25 }
  0xf9   : > { %v773_v31 = vxor.u32 2147483648, %v1230_v27  ;;  %vm878_vm13 = vcmp.eq.s32.totalorder %v873_v52, 2  ;;  %vm874_vm15 = vcmp.lt.s32.totalorder %v873_v52, 2  ;;  %vm875_vm0 = vcmp.eq.s32.totalorder %v873_v52, 0 }
  0xfa   : > { %v777_v55 = vsel %vm775_vm6, %v776_v29, %v1230_v27  ;;  %v863_v46 = vmul.f32 %v862_v33, %v860_v43  ;;  %v945_v10 = vshrl.u32 %v944_v18, 30 }
  0xfb   : > { %v774_v0 = vsel %vm772_vm8, %v1228_v20, %v773_v31 }
  0xfc   : > { %v778_v61 = vsel %vm771_vm9, %v774_v0, %v777_v55  ;;  %v864_v23 = vxor.u32 2147483648, %v863_v46  ;;  %v946_v38 = vshll.u32 %v945_v10, 30  ;;  %v969_v15 = vsub.s32 4, %v945_v10 }
  0xfd   : > { %v779_v49 = vsel %vm769_vm10, nan, %v778_v61 }
  0xfe   : > { %991 = vst [vmem:[%s1736_s11 + $0x28] sm:$0xff] %v779_v49  ;;  %v865_v45 = vsel %vm782_vm11, %v864_v23, %v863_v46  ;;  %v947_v60 = vsub.s32 %v943_v25, %v946_v38  ;;  %v970_v36 = vsel %vm885_vm2, %v969_v15, %v945_v10 }
  0xff   : > { %v868_v59 = vsel %vm781_vm12, %v1447_v39, %v865_v45  ;;  %v972_v26 = vsel %vm884_vm3, 0, %v970_v36 }
 0x100   : > { %1231 = vcosq.f32 %v868_v59  ;;  %v949_v12 = vsub.s32 0, %v947_v60  ;;  %v976_v3 = vand.u32 3, %v972_v26 }
 0x101   : > { %1233 = vsinq.f32 %v868_v59 }
 0x102   : > { %v1108_v14 = vmin.u32 %v949_v12, %v947_v60  ;;  %vm981_vm4 = vcmp.eq.s32.totalorder %v976_v3, 2  ;;  %vm978_vm5 = vcmp.eq.s32.totalorder %v976_v3, 0  ;;  %vm977_vm6 = vcmp.lt.s32.totalorder %v976_v3, 2 }
 0x104   : > { %v951_v13 = vclz %v1108_v14 }
 0x106   : > { %v1109_v53 = vadd.s32 4294967294, %v951_v13 }
 0x108   : > { %vm1110_vm14 = vcmp.lt.s32.totalorder %v1109_v53, 0 }
 0x109   : > { %v954_v7 = vsel %vm1110_vm14, 0, %v1109_v53 }
 0x10a   : > { %v1232_v57 = vpop.eup %1231  ;;  %v955_v58 = vsub.s32 32, %v954_v7  ;;  %v956_v21 = vshll.u32 %v947_v60, %v954_v7  ;;  %v959_v6 = vsub.s32 4294967266, %v954_v7 }
 0x10b   : > { %v1234_v16 = vpop.eup %1233  ;;  %v879_v54 = vxor.u32 2147483648, %v1232_v57 }
 0x10c   : > { %v876_v56 = vxor.u32 2147483648, %v1234_v16  ;;  %v957_v2 = vshrl.u32 %v939_v8, %v955_v58  ;;  %v960_v41 = vadd.s32 127, %v959_v6 }
 0x10d   : > { %v880_v24 = vsel %vm878_vm13, %v879_v54, %v1234_v16 }
 0x10e   : > { %v877_v28 = vsel %vm875_vm0, %v1232_v57, %v876_v56  ;;  %v958_v17 = vor.u32 %v957_v2, %v956_v21  ;;  %v961_v44 = vshll.u32 %v960_v41, 23 }
 0x10f   : > { %v881_v35 = vsel %vm874_vm15, %v877_v28, %v880_v24 }
 0x110   : > { %v882_v63 = vsel %vm872_vm1, nan, %v881_v35  ;;  %v962_v62 = vor.u32 4788187, %v961_v44  ;;  %v965_v9 = vcvt.s32.f32 %v958_v17 }
 0x111   : > { %992 = vst [vmem:[%s1736_s11 + $0x30] sm:$0xff] %v882_v63 }
 0x112   : > { %v963_v42 = vand.u32 2147483647, %v962_v62 }
 0x114   : > { %v966_v11 = vmul.f32 %v965_v9, %v963_v42 }
 0x116   : > { %v967_v39 = vxor.u32 2147483648, %v966_v11 }
 0x118   : > { %v968_v19 = vsel %vm885_vm2, %v967_v39, %v966_v11 }
 0x119   : > { %v971_v5 = vsel %vm884_vm3, %v1449_v40, %v968_v19 }
 0x11a   : > { %1235 = vcosq.f32 %v971_v5 }
 0x11b   : > { %1237 = vsinq.f32 %v971_v5 }
 0x124   : > { %v1236_v51 = vpop.eup %1235 }
 0x125   : > { %v1238_v47 = vpop.eup %1237  ;;  %v982_v50 = vxor.u32 2147483648, %v1236_v51 }
 0x126   : > { %v979_v34 = vxor.u32 2147483648, %v1238_v47 }
 0x127   : > { %v983_v1 = vsel %vm981_vm4, %v982_v50, %v1238_v47 }
 0x128   : > { %v980_v20 = vsel %vm978_vm5, %v1236_v51, %v979_v34 }
 0x129   : > { %v984_v37 = vsel %vm977_vm6, %v980_v20, %v983_v1 }
 0x12a   : > { %v985_v27 = vsel %vm975_vm7, nan, %v984_v37 }
 0x12b   : > { %993 = vst [vmem:[%s1736_s11 + $0x38] sm:$0xff] %v985_v27 }
 0x12c   : > { %1280 = shalt.err (!%p1277_p4)
}
 0x12d   : > { %s1281_s25 = scalar_lea.hbm %s2020_s20, 1024  ;;  %s1285_s28 = scalar_lea.hbm %s2069_s1, 2048 }
 0x12e   : > { %p1282_p7 = scmp.ne.s32.totalorder %s2020_s20, %s1281_s25  ;;  %p1286_p13 = scmp.lt.u32.totalorder %s2020_s20, %s2069_s1 }
 0x12f   : > { %p1287_p1 = scmp.lt.u32.totalorder %s1285_s28, %s1281_s25  ;;  %p1289_p5 = scmp.lt.u32.totalorder %s1281_s25, %s2020_s20 }
 0x130   : > { %p1283_p8 = pnand %p1282_p7, %p2092_p6 }
 0x131   : > { %p1288_p0 = por %p1287_p1, %p1286_p13 }
 0x132   : > { %p1284_p11 = pneg %p1283_p8 }
 0x133   : > { %p1290_p9 = por %p1289_p5, %p1288_p0 }
 0x135   : > { %p1291_p10 = pnand %p1290_p9, %p1284_p11 }
 0x137   : > { %1294 = shalt.err (!%p1291_p10)
}
 0x138   : > { %s1343_s2 = smov 128   ;;  %s1344_s3 = smov 8  }
 0x139   : > { %1153 = dma.vmem_to_hbm [thread:$0]  (%p2092_p6), %s2022_s14, 1024, %s2020_s20, %s2027_s10, %s1343_s2, %s1343_s2, %s1344_s3  }
 0x13a PF: > { %p1165_p12 = scmp.ge.s32.totalorder %s1333_s9, 2  ;;  %s1023_s4 = sand.u32 1, %s1321_s6  }
 0x13b   : > { %p2093_p2 = scmp.ne.s32.totalorder %s2074_s17, 0  ;;  %s1024_s5 = scalar_lea.sflag [#allocation4], %s1023_s4 }
 0x13d   : > { %p1160_p3 = pnand %p1165_p12, %p2093_p2 }
 0x13f   : > { %1316 = dma.done.wait (!%p1160_p3), %s1024_s5, 1024  }
 0x140   : > { %1318 = vsyncadd (!%p1160_p3), %s1024_s5, 4294966272  ;;  %p12_p4 = scmp.ge.s32.totalorder %s1380_s12, 4   ;;  %s2094_s6 = smov %s1325_s7 }
 0x141   : > { %s2095_s7 = smov %s1329_s8  ;;  %s2096_s8 = smov %s1391_s15 }
 0x142   : > { %s2097_s9 = smov %s1380_s12  ;;  %14 = sbr.rel (!%p12_p4) target bundleno = 4 (0x4), region = 61 }
 0x149   :  { %1029 = vsyncpa [#allocation3], 1 }
 0x14a   :  { %1031 = vsyncpa [#allocation3 + $0x1], 1 }
 0x14b   :  { %1032 = vsyncpa [#allocation4], 1 }
 0x14c   :  { %1034 = vsyncpa [#allocation4 + $0x1], 1 }

</bundles_post_ra>
